<compile_context>
chip_gen: v7x
topology: tpu7x:2x2x1
jax: 0.10.0
libtpu: 0.0.40
codegen_flags: <defaults>
</compile_context>

<pallas_src>
import functools
import math

import jax
import jax.numpy as jnp
from jax.experimental import pallas as pl
from jax.experimental.pallas import tpu as pltpu


_LANE = 128
_VMEM_LIMIT_BYTES = 40 * 1024 * 1024        # headroom under v7x's 64 MiB VMEM
_RESIDENT_BUDGET_BYTES = 28 * 1024 * 1024   # working-set cap for resident mode


def _pad_axis(a, axis, multiple):
    size = a.shape[axis]
    pad = (-size) % multiple
    if pad == 0:
        return a
    widths = [(0, 0)] * a.ndim
    widths[axis] = (0, pad)
    return jnp.pad(a, widths)


def _pick_tile(total, want):
    """Largest tile <= want that divides `total` (prefers multiples of 128)."""
    want = min(want, total)
    if want == total:
        return total
    t = (want // _LANE) * _LANE
    while t >= _LANE:
        if total % t == 0:
            return t
        t -= _LANE
    return total  # full extent always legal


# ---------------------------------------------------------------------------
# Kernel 1: feature transform  XW = X @ W   (small; computed once per layer)
# ---------------------------------------------------------------------------
def _xw_kernel(x_ref, w_ref, o_ref):
    o_ref[...] = jnp.dot(
        x_ref[...], w_ref[...], preferred_element_type=jnp.float32
    ).astype(o_ref.dtype)


def feature_transform(x, w, *, tile_n=512, out_dtype=jnp.bfloat16):
    """X @ W, row-tiled; W stays resident (constant index map). bf16 output."""
    n, fin = x.shape
    fout = w.shape[1]
    tn = _pick_tile(n, tile_n)

    return pl.pallas_call(
        _xw_kernel,
        out_shape=jax.ShapeDtypeStruct((n, fout), out_dtype),
        grid=(n // tn,),
        in_specs=[
            pl.BlockSpec((tn, fin), lambda i: (i, 0)),
            pl.BlockSpec((fin, fout), lambda i: (0, 0)),   # resident weight
        ],
        out_specs=pl.BlockSpec((tn, fout), lambda i: (i, 0)),
        compiler_params=pltpu.CompilerParams(
            dimension_semantics=("parallel",),
            vmem_limit_bytes=_VMEM_LIMIT_BYTES,
        ),
    )(x, w)


# ---------------------------------------------------------------------------
# Kernel 2: aggregation  Y = A @ XW  (+ optional ReLU, optional fused @ Wnext)
# ---------------------------------------------------------------------------
def _agg_resident_kernel(a_ref, xw_ref, o_ref, *, apply_relu):
    acc = jnp.dot(a_ref[...], xw_ref[...], preferred_element_type=jnp.float32)
    if apply_relu:
        acc = jnp.maximum(acc, 0.0)
    o_ref[...] = acc.astype(o_ref.dtype)


def _agg_resident_fused_kernel(a_ref, xw_ref, wn_ref, o_ref, *, apply_relu):
    acc = jnp.dot(a_ref[...], xw_ref[...], preferred_element_type=jnp.float32)
    if apply_relu:
        acc = jnp.maximum(acc, 0.0)
    # Fused next-layer feature transform: relu(A @ XW1) @ W2, no HBM round trip.
    o_ref[...] = jnp.dot(
        acc.astype(wn_ref.dtype), wn_ref[...],
        preferred_element_type=jnp.float32,
    ).astype(o_ref.dtype)


def _agg_ktiled_kernel(a_ref, xw_ref, o_ref, *, apply_relu):
    # f32 output block is resident across the K axis -> accumulate in place.
    @pl.when(pl.program_id(1) == 0)
    def _():
        o_ref[...] = jnp.zeros_like(o_ref)

    o_ref[...] += jnp.dot(
        a_ref[...], xw_ref[...], preferred_element_type=jnp.float32
    )

    if apply_relu:
        @pl.when(pl.program_id(1) == pl.num_programs(1) - 1)
        def _():
            o_ref[...] = jnp.maximum(o_ref[...], 0.0)


def aggregate(adj, xw, *, apply_relu, w_next=None,
              tile_n=512, tile_k=2048, out_dtype=jnp.float32):
    """Computes adj @ xw (optional ReLU, optional fused @ w_next).

    Mode A (preferred): XW (and w_next) fully VMEM-resident, single grid axis
    over row tiles -> adjacency is the only streamed array, read once.
    Mode B (fallback, huge graphs): K-tiled with direct accumulation into the
    resident f32 output block.
    """
    n, k = adj.shape
    fout = xw.shape[1]
    assert xw.shape[0] == k
    n_out = w_next.shape[1] if w_next is not None else fout
    out_itemsize = jnp.dtype(out_dtype).itemsize

    resident_bytes = k * fout * xw.dtype.itemsize
    if w_next is not None:
        resident_bytes += w_next.size * w_next.dtype.itemsize

    # ---- Mode A: pick the largest row tile whose working set fits VMEM. ----
    tn = _pick_tile(n, tile_n)
    while tn is not None:
        need = (resident_bytes
                + 2 * tn * k * adj.dtype.itemsize        # double-buffered adj slab
                + 2 * tn * n_out * out_itemsize)         # double-buffered output
        if need <= _RESIDENT_BUDGET_BYTES:
            break
        nxt = _pick_tile(n, tn // 2) if tn > _LANE else None
        tn = nxt if (nxt is not None and nxt < tn) else None

    if tn is not None:
        if w_next is None:
            kernel = functools.partial(_agg_resident_kernel, apply_relu=apply_relu)
            in_specs = [
                pl.BlockSpec((tn, k), lambda i: (i, 0)),
                pl.BlockSpec((k, fout), lambda i: (0, 0)),       # resident XW
            ]
            operands = (adj, xw)
        else:
            kernel = functools.partial(_agg_resident_fused_kernel,
                                       apply_relu=apply_relu)
            in_specs = [
                pl.BlockSpec((tn, k), lambda i: (i, 0)),
                pl.BlockSpec((k, fout), lambda i: (0, 0)),       # resident XW
                pl.BlockSpec((fout, n_out), lambda i: (0, 0)),   # resident W2
            ]
            operands = (adj, xw, w_next)

        return pl.pallas_call(
            kernel,
            out_shape=jax.ShapeDtypeStruct((n, n_out), out_dtype),
            grid=(n // tn,),
            in_specs=in_specs,
            out_specs=pl.BlockSpec((tn, n_out), lambda i: (i, 0)),
            compiler_params=pltpu.CompilerParams(
                dimension_semantics=("parallel",),
                vmem_limit_bytes=_VMEM_LIMIT_BYTES,
            ),
        )(*operands)

    # ---- Mode B: K-tiled fallback (no fusion; accumulate into o_ref). ----
    tn = _pick_tile(n, tile_n)
    tk = _pick_tile(k, tile_k)
    kernel = functools.partial(_agg_ktiled_kernel, apply_relu=apply_relu)
    y = pl.pallas_call(
        kernel,
        out_shape=jax.ShapeDtypeStruct((n, fout), jnp.float32),
        grid=(n // tn, k // tk),
        in_specs=[
            pl.BlockSpec((tn, tk), lambda i, kk: (i, kk)),
            pl.BlockSpec((tk, fout), lambda i, kk: (kk, 0)),
        ],
        out_specs=pl.BlockSpec((tn, fout), lambda i, kk: (i, 0)),
        compiler_params=pltpu.CompilerParams(
            dimension_semantics=("parallel", "arbitrary"),
            vmem_limit_bytes=_VMEM_LIMIT_BYTES,
        ),
    )(adj, xw)

    if w_next is not None:
        # Fusion dropped in the fallback; apply next-layer weight separately.
        return feature_transform(y.astype(jnp.bfloat16), w_next,
                                 tile_n=tile_n, out_dtype=out_dtype)
    return y.astype(out_dtype)


# ---------------------------------------------------------------------------
# Module forward
# ---------------------------------------------------------------------------
def prepare_adjacency(adj, dtype=jnp.bfloat16):
    """One-time preprocessing (hoisted out of the forward): pad the N x N
    adjacency to lane multiples and cast to bf16, so the cast's ~6*N^2 bytes
    of HBM traffic are not paid on every call."""
    adj = _pad_axis(_pad_axis(adj, 0, _LANE), 1, _LANE)
    return adj.astype(dtype)


def gnnpa_forward(x, adj_p, w1, w2, *, tile_n=512, tile_k=2048):
    """Forward pass of GNNpa in eval mode.

    x:     [N, num_feature]
    adj_p: [Np, Np] bf16, from prepare_adjacency() (Np = N padded to 128).
    w1:    [num_feature, hidden_dim]
    w2:    [hidden_dim, num_class]
    """
    n = x.shape[0]
    num_class = w2.shape[1]
    np_ = adj_p.shape[0]

    # Pad widths to lane multiples (128) only: lane-dense unmasked stores and
    # a full MXU N dim.  Padding columns/rows are exactly zero -> inert.
    w1p = _pad_axis(w1, 1, _LANE).astype(jnp.bfloat16)                 # (Fin, Hp)
    hp = w1p.shape[1]
    w2p = _pad_axis(w2, 1, _LANE)                                      # (H, Cp)
    w2p = jnp.pad(w2p, ((0, hp - w2p.shape[0]), (0, 0))).astype(jnp.bfloat16)  # (Hp, Cp)

    # Pad node rows to match the padded adjacency (zero rows -> zero output rows).
    x_p = _pad_axis(x.astype(jnp.bfloat16), 0, np_)

    # TODO(synk): training-mode dropout (random masks) not implemented; this
    # reproduces the deterministic inference path (F.dropout == identity).

    # Layer 1 feature transform: XW1 = x @ W1 (computed exactly once).
    xw1 = feature_transform(x_p, w1p, tile_n=tile_n)                   # bf16 (Np, Hp)

    # Layer 1 aggregate fused with layer-2's feature transform:
    #   XW2 = relu(A @ XW1) @ W2   -- hidden h never touches HBM.
    xw2 = aggregate(adj_p, xw1, apply_relu=True, w_next=w2p,
                    tile_n=tile_n, tile_k=tile_k,
                    out_dtype=jnp.bfloat16)                            # bf16 (Np, Cp)

    # Layer 2 aggregate: out = A @ XW2.
    out_p = aggregate(adj_p, xw2, apply_relu=False,
                      tile_n=tile_n, tile_k=tile_k,
                      out_dtype=jnp.float32)                           # f32 (Np, Cp)

    return out_p[:n, :num_class]


def init_gcn_weight(key, fan_in, fan_out, dtype=jnp.float32):
    # Matches GraphConvolution.reset_parameters(): uniform(-stdv, stdv),
    # stdv = 1/sqrt(out_features).
    stdv = 1.0 / math.sqrt(fan_out)
    return jax.random.uniform(
        key, (fan_in, fan_out), dtype=dtype, minval=-stdv, maxval=stdv)


if __name__ == "__main__":
    # Small, deterministic problem: N nodes, num_feature, hidden_dim, num_class.
    N = 128
    NUM_FEATURE = 32
    HIDDEN_DIM = 32
    NUM_CLASS = 8

    key = jax.random.PRNGKey(0)
    k_x, k_adj, k_w1, k_w2 = jax.random.split(key, 4)

    # Node features.
    x = jax.random.normal(k_x, (N, NUM_FEATURE), dtype=jnp.float32)

    # Symmetric, row-normalized adjacency with self-loops (typical GCN adj).
    a_raw = (jax.random.uniform(k_adj, (N, N)) > 0.9).astype(jnp.float32)
    a_sym = jnp.maximum(a_raw, a_raw.T) + jnp.eye(N, dtype=jnp.float32)
    adj = a_sym / jnp.sum(a_sym, axis=1, keepdims=True)

    # Layer weights (deterministic init matching the PyTorch module shapes).
    w1 = init_gcn_weight(k_w1, NUM_FEATURE, HIDDEN_DIM)
    w2 = init_gcn_weight(k_w2, HIDDEN_DIM, NUM_CLASS)

    # Hoisted one-time bf16 cast + lane padding of the adjacency.
    adj_p = prepare_adjacency(adj)

    out = gnnpa_forward(x, adj_p, w1, w2)
    out = jax.block_until_ready(out)

    # Pure-f32 reference; kernels use bf16 operands with f32 accumulation,
    # so compare with a bf16-appropriate tolerance.
    h_ref = jnp.maximum(adj @ (x @ w1), 0.0)
    out_ref = adj @ (h_ref @ w2)
    assert out.shape == (N, NUM_CLASS)
    max_err = float(jnp.max(jnp.abs(out - out_ref)))
    assert jnp.allclose(out, out_ref, atol=2e-2, rtol=2e-2), max_err

    print("KERNEL_OK")
</pallas_src>

<mosaic_0001>
module attributes {stable_mosaic.version = 11 : i64} {
  func.func @_xw_kernel(%arg0: i32, %arg1: memref<128x32xbf16, #tpu.memory_space<vmem>>, %arg2: memref<32x128xbf16, #tpu.memory_space<vmem>>, %arg3: memref<128x128xbf16, #tpu.memory_space<vmem>>) attributes {dimension_semantics = [#tpu.dimension_semantics<parallel>], iteration_bounds = array<i64: 1>, scalar_prefetch = 0 : i64, scratch_operands = 0 : i64, tpu.core_type = #tpu.core_type<tc>, window_params = [{transform_indices = @transform_0, window_bounds = array<i64: 128, 32>}, {pipeline_mode = #tpu.pipeline_mode<synchronous>, transform_indices = @transform_1, window_bounds = array<i64: 32, 128>}, {transform_indices = @transform_2, window_bounds = array<i64: 128, 128>}]} {
    %c0 = arith.constant 0 : index
    %c0_0 = arith.constant 0 : index
    %0 = vector.load %arg1[%c0, %c0_0] : memref<128x32xbf16, #tpu.memory_space<vmem>>, vector<128x32xbf16>
    %c0_1 = arith.constant 0 : index
    %c0_2 = arith.constant 0 : index
    %1 = vector.load %arg2[%c0_1, %c0_2] : memref<32x128xbf16, #tpu.memory_space<vmem>>, vector<32x128xbf16>
    %cst = arith.constant dense<0.000000e+00> : vector<128x128xf32>
    %2 = tpu.matmul %0, %1, %cst {dimension_numbers = #tpu.dot_dimension_numbers<[1], [0], [0], [1], [0, 0, 1, 1], [], []>} : vector<128x32xbf16>, vector<32x128xbf16>, vector<128x128xf32> -> vector<128x128xf32>
    %3 = arith.truncf %2 : vector<128x128xf32> to vector<128x128xbf16>
    %c0_3 = arith.constant 0 : index
    %c0_4 = arith.constant 0 : index
    %4 = vector.load %arg3[%c0_3, %c0_4] : memref<128x128xbf16, #tpu.memory_space<vmem>>, vector<128x128xbf16>
    tpu.vector_store %arg3[%c0_3, %c0_4], %3 {strides = array<i32>} : memref<128x128xbf16, #tpu.memory_space<vmem>>, vector<128x128xbf16>,
    return
  }
  func.func @transform_0(%arg0: i32) -> (i32, i32) {
    %c0_i32 = arith.constant 0 : i32
    %c0_i32_0 = arith.constant 0 : i32
    return %arg0, %c0_i32 : i32, i32
  }
  func.func @transform_1(%arg0: i32) -> (i32, i32) {
    %c0_i32 = arith.constant 0 : i32
    %c0_i32_0 = arith.constant 0 : i32
    %c0_i32_1 = arith.constant 0 : i32
    return %c0_i32, %c0_i32_0 : i32, i32
  }
  func.func @transform_2(%arg0: i32) -> (i32, i32) {
    %c0_i32 = arith.constant 0 : i32
    %c0_i32_0 = arith.constant 0 : i32
    return %arg0, %c0_i32 : i32, i32
  }
}

</mosaic_0001>

<bundles_post_ra>
// kernel: tpu_custom_call.1
= control target key start
LH: loop header
LB: loop body
LE: loop exit
PB: predicated region body
PF: predicated region fallthrough
CT: control target
= control target key end

     0   :  { %vm85_vm0 = vcmask 261120   ;;  %s539_s0 = inlined_call_operand.vmem [shape: bf16[128,32], index: 0, kind: input, shape index: {}]   ;;  %s540_s1 = inlined_call_operand.vmem [shape: bf16[32,128], index: 1, kind: input, shape index: {}]   ;;  %s541_s2 = inlined_call_operand.hbm [shape: bf16[128,128], index: 2, kind: output, shape index: {}]  }
   0x1   :  { %v437_v0 = vld [vmem:[%s540_s1] sm:$0xff]   ;;  %v438_v1 = vld [vmem:[%s540_s1 + $0x8] sm:$0xff]   ;;  %v443_v6 = vld [vmem:[%s539_s0 + $0x10] sm:$0xff]  }
   0x2   :  { %410 = vmatprep.subr.bf16.mxu0 %v437_v0  ;;  %430 = vmatprep.subr.bf16.mxu1 %v437_v0  ;;  %v439_v2 = vld [vmem:[%s539_s0] sm:$0xff]   ;;  %v441_v4 = vld [vmem:[%s539_s0 + $0x8] sm:$0xff]   ;;  %v444_v7 = vld [vmem:[%s539_s0 + $0x30] sm:$0xff]  }
   0x3   :  { %411 = vmatpush3.bf16.msra.mxu0 %v437_v0  ;;  %432 = vmatpush3.bf16.msra.mxu1 %v437_v0  ;;  %v440_v3 = vld [vmem:[%s539_s0 + $0x20] sm:$0xff]   ;;  %v442_v5 = vld [vmem:[%s539_s0 + $0x28] sm:$0xff]  }
   0x4   :  { %412 = vmatprep.subr.bf16.mxu0 %v438_v1  ;;  %431 = vmatprep.subr.bf16.mxu1 %v438_v1 }
   0x5   :  { %414 = vmatprep.mubr.msk.bf16.mxu0 %vm85_vm0, %v439_v2  ;;  %422 = vmatprep.mubr.msk.bf16.mxu1 %vm85_vm0, %v440_v3 }
   0x7   :  { %413 = vmatpush3.bf16.msra.mxu0 %v438_v1  ;;  %433 = vmatpush3.bf16.msra.mxu1 %v438_v1 }
   0xa   :  { %415 = vmatmul.mubr.msk.bf16.vlgmr.msra.gmra.mrb[0].mxu0 %vm85_vm0, %v441_v4  ;;  %423 = vmatmul.mubr.msk.bf16.vlgmr.msra.gmra.mrb[0].mxu1 %vm85_vm0, %v442_v5 }
   0xb   :  { %7 = vsyncpa [#allocation3], 0  ;;  %418 = vmatprep.mubr.msk.bf16.mxu0 %vm85_vm0, %v443_v6  ;;  %426 = vmatprep.mubr.msk.bf16.mxu1 %vm85_vm0, %v444_v7  ;;  %v445_v8 = vld [vmem:[%s539_s0 + $0x18] sm:$0xff]  }
   0xc   :  { %v446_v9 = vld [vmem:[%s539_s0 + $0x38] sm:$0xff]   ;;  %s471_s0 = smov [#allocation2]  }
   0xd   :  { %s292_s28 = sshll.u32 %s471_s0, 4  ;;  %s293_s28 = int_to_ptr.vmem [resolvable:$true] %s292_s28 }
   0xe   :  { %s447_s29 = scalar_lea.vmem %s293_s28, 1024  ;;  %p452_p1 = scmp.lt.s32.totalorder %s293_s28, %s293_s28 }
   0xf   :  { %p448_p0 = scmp.ne.s32.totalorder %s293_s28, %s447_s29  ;;  %p453_p2 = scmp.lt.s32.totalorder %s447_s29, %s447_s29 }
  0x11   :  { %p454_p3 = por %p453_p2, %p452_p1 }
  0x12   :  { %419 = vmatmul.mubr.msk.bf16.gmra.mrb[4].mxu0 %vm85_vm0, %v445_v8  ;;  %427 = vmatmul.mubr.msk.bf16.gmra.mrb[4].mxu1 %vm85_vm0, %v446_v9 }
  0x13   :  { %p455_p4 = pnand %p454_p3, %p448_p0 }
  0xdd   :  { %v416_v10 = vpop.f32.mrb[0].mxu0  ;;  %v424_v11 = vpop.f32.mrb[0].mxu1 }
  0xde   :  { %v144_v12 = vpop.f32.mrb[1].mxu0  ;;  %v176_v13 = vpop.f32.mrb[1].mxu1 }
  0xdf   :  { %v417_v14 = vpop.f32.mrb[2].mxu0  ;;  %v425_v15 = vpop.f32.mrb[2].mxu1 }
  0xe0   :  { %v361_v16 = vpack.c.bf16 %v417_v14, %v416_v10  ;;  %v381_v17 = vpack.c.bf16 %v425_v15, %v424_v11  ;;  %v147_v18 = vpop.f32.mrb[3].mxu0  ;;  %v179_v19 = vpop.f32.mrb[3].mxu1 }
  0xe1   :  { %v356_v20 = vpack.c.bf16 %v147_v18, %v144_v12  ;;  %v376_v21 = vpack.c.bf16 %v179_v19, %v176_v13 }
  0xe2   :  { %393 = vst [vmem:[#allocation2 + $0x8] sm:$0xff] %v361_v16   ;;  %397 = vst [vmem:[#allocation2 + $0x28] sm:$0xff] %v381_v17  }
  0xe3   :  { %357 = vst [vmem:[#allocation2] sm:$0xff] %v356_v20   ;;  %396 = vst [vmem:[#allocation2 + $0x20] sm:$0xff] %v376_v21  }
  0xe5   :  { %v420_v22 = vpop.f32.mrb[4].mxu0  ;;  %v428_v23 = vpop.f32.mrb[4].mxu1 }
  0xe6   :  { %v160_v24 = vpop.f32.mrb[5].mxu0  ;;  %v192_v25 = vpop.f32.mrb[5].mxu1 }
  0xe7   :  { %v421_v26 = vpop.f32.mrb[6].mxu0  ;;  %v429_v27 = vpop.f32.mrb[6].mxu1 }
  0xe8   :  { %v371_v28 = vpack.c.bf16 %v421_v26, %v420_v22  ;;  %v391_v29 = vpack.c.bf16 %v429_v27, %v428_v23  ;;  %v163_v30 = vpop.f32.mrb[7].mxu0  ;;  %v195_v31 = vpop.f32.mrb[7].mxu1 }
  0xe9   :  { %v366_v32 = vpack.c.bf16 %v163_v30, %v160_v24  ;;  %v386_v33 = vpack.c.bf16 %v195_v31, %v192_v25 }
  0xea   :  { %395 = vst [vmem:[#allocation2 + $0x18] sm:$0xff] %v371_v28   ;;  %399 = vst [vmem:[#allocation2 + $0x38] sm:$0xff] %v391_v29  }
  0xeb   :  { %394 = vst [vmem:[#allocation2 + $0x10] sm:$0xff] %v366_v32   ;;  %398 = vst [vmem:[#allocation2 + $0x30] sm:$0xff] %v386_v33  }
  0xec   :  { %458 = shalt.err (!%p455_p4)
}
  0xed   :  { %s459_s4 = scalar_lea.hbm %s541_s2, 1024 }
  0xee   :  { %p460_p5 = scmp.ne.s32.totalorder %s541_s2, %s459_s4  ;;  %p463_p6 = scmp.lt.u32.totalorder %s459_s4, %s541_s2 }
  0xf0   :  { %p465_p7 = pnand %p463_p6, %p460_p5 }
  0xf2   :  { %468 = shalt.err (!%p465_p7)
}
  0xf3   :  { %s472_s9 = smov 64   ;;  %s473_s10 = smov 4  }
  0xf4   :  { %298 = dma.vmem_to_hbm [thread:$0]  %s293_s28, 1024, %s541_s2, [#allocation3], %s472_s9, %s472_s9, %s473_s10  }
  0xf5   :  { %469 = dma.done.wait [#allocation3], 1024  }
  0xf6   :  { %470 = vsyncadd [#allocation3], 4294966272 }
  0xf7   :  { %302 = vsyncpa [#allocation3], 1 }

</bundles_post_ra>
